<compile_context>
chip_gen: v7x
topology: tpu7x:2x2x1
jax: 0.10.0
libtpu: 0.0.40
codegen_flags: <defaults>
</compile_context>

<pallas_src>
import functools

import numpy as np
import jax
import jax.numpy as jnp
from jax.experimental import pallas as pl
from jax.experimental.pallas import tpu as pltpu


_CHUNK = 2048  # in-kernel compute chunk (lanes); multiple of 128


def _dice_consist_kernel(pred_ref, gt_ref, mask_ref, acc_ref, *,
                         apply_sigmoid, s, chunk, n_chunks, thw, hw,
                         tiles_per_part, n_tiles,
                         needs_tile_guard, needs_lane_mask):
    # pred_ref, gt_ref : (1, S, thw)   native dtype, upcast in-kernel
    # mask_ref         : (1, S, 1)     f32, 1.0 = slice counted in dice sums
    # acc_ref          : (1, S+2, 1)   resident accumulator slab per (part, b):
    #                    row 0 = inter, 1 = psum, 2 = gsum, 3.. = pair sq-norms
    part = pl.program_id(0)
    t = pl.program_id(2)
    g_tile = part * tiles_per_part + t      # global pixel-tile index

    @pl.when(t == 0)
    def _init():
        acc_ref[...] = jnp.zeros_like(acc_ref)

    def _compute():
        m = mask_ref[0]                                        # (S, 1)

        if needs_lane_mask:
            # lane iota hoisted out of the chunk loop (no CSE for broadcasts)
            lane = jax.lax.broadcasted_iota(jnp.int32, (s, chunk), 1)
            rem = hw - g_tile * thw        # valid lanes remaining in this tile

        interS = jnp.zeros((s, 1), jnp.float32)
        psumS = jnp.zeros((s, 1), jnp.float32)
        gsumS = jnp.zeros((s, 1), jnp.float32)
        pairsS = jnp.zeros((s - 1, 1), jnp.float32)

        # Static unrolled walk over the tile: big DMA blocks, small f32 temps.
        for c in range(n_chunks):
            off = c * chunk
            x = pred_ref[0, :, off:off + chunk].astype(jnp.float32)  # (S, chunk)
            y = gt_ref[0, :, off:off + chunk].astype(jnp.float32)    # (S, chunk)

            if apply_sigmoid:
                # sigmoid(x) == 0.5*tanh(0.5*x) + 0.5  (one EUP op, no divide)
                p = jnp.tanh(x * 0.5) * 0.5 + 0.5
            else:
                p = x

            if needs_lane_mask:
                valid = lane < (rem - off)
                p = jnp.where(valid, p, 0.0)
                y = jnp.where(valid, y, 0.0)

            interS = interS + jnp.sum(p * y, axis=-1, keepdims=True)
            psumS = psumS + jnp.sum(p, axis=-1, keepdims=True)
            gsumS = gsumS + jnp.sum(y, axis=-1, keepdims=True)
            d = p[1:, :] - p[:-1, :]
            pairsS = pairsS + jnp.sum(d * d, axis=-1, keepdims=True)

        acc_ref[0, 0:1, :] += jnp.sum(interS * m, axis=0, keepdims=True)
        acc_ref[0, 1:2, :] += jnp.sum(psumS * m, axis=0, keepdims=True)
        acc_ref[0, 2:3, :] += jnp.sum(gsumS * m, axis=0, keepdims=True)
        acc_ref[0, 3:, :] += pairsS

    if needs_tile_guard:
        pl.when(g_tile < n_tiles)(_compute)
    else:
        _compute()


def _pick_tiles(hw, s, itemsize, *, budget_bytes=24 * 1024 * 1024,
                lane_cap=32768):
    """Pick (pixel-tile size thw, in-kernel compute chunk).

    Sized so double-buffered pred+gt blocks (2 inputs x 2 buffers x S x thw x
    itemsize) stay under `budget_bytes` (fits v7x's 64 MiB VMEM with headroom).
    """
    cap = max(128, min(lane_cap, budget_bytes // (4 * s * itemsize)))
    if hw <= min(cap, _CHUNK):
        return hw, hw                       # one tile == full pixel axis
    if cap >= _CHUNK and hw >= _CHUNK:
        thw = min((cap // _CHUNK) * _CHUNK, (hw // _CHUNK) * _CHUNK)
        return thw, _CHUNK
    thw = (cap // 128) * 128                # very large S: small aligned tile
    return thw, thw


def masked_dice_loss_slice_consist(pred, gt, mask=None, force_strong=None,
                                   force_weak=None, *, logit=True, smooth=0.1):
    """Forward of MaskedDiceLoss_SliceConsist.  pred, gt: (N, S, H, W)."""
    N, S, H, W = pred.shape
    assert S >= 2, "slice-consistency term needs at least 2 slices"
    HW = H * W

    itemsize = max(pred.dtype.itemsize, gt.dtype.itemsize)
    thw, chunk = _pick_tiles(HW, S, itemsize)
    n_chunks = thw // chunk
    n_tiles = (HW + thw - 1) // thw
    needs_lane_mask = (HW % thw != 0)

    # v7x megacore: with N == 1 split the pixel reduction into 2 independent
    # partial accumulations so both TensorCores get work.
    P = 2 if (N == 1 and n_tiles >= 2) else 1
    T = (n_tiles + P - 1) // P
    needs_tile_guard = (P * T != n_tiles)

    pred3 = pred.reshape(N, S, HW)          # free reshape (contiguous), no cast
    gt3 = gt.reshape(N, S, HW)

    if mask is None:
        mask_slices = jnp.ones((N, S), jnp.float32)
    else:
        mask_slices = mask.astype(jnp.float32)
    # dice keeps pixels whose tiled mask value is exactly 1.0
    dice_mask = (mask_slices == 1.0).astype(jnp.float32).reshape(N, S, 1)

    kernel = functools.partial(
        _dice_consist_kernel, apply_sigmoid=logit, s=S, chunk=chunk,
        n_chunks=n_chunks, thw=thw, hw=HW, tiles_per_part=T, n_tiles=n_tiles,
        needs_tile_guard=needs_tile_guard, needs_lane_mask=needs_lane_mask)

    if needs_tile_guard:
        def in_idx(part, b, t):
            # last partition may carry a dummy step; clamp (its compute is
            # skipped via pl.when inside the kernel)
            return (b, 0, jnp.minimum(part * T + t, n_tiles - 1))
    else:
        def in_idx(part, b, t):
            return (b, 0, part * T + t)

    acc = pl.pallas_call(
        kernel,
        out_shape=jax.ShapeDtypeStruct((P * N, S + 2, 1), jnp.float32),
        grid_spec=pltpu.PrefetchScalarGridSpec(
            num_scalar_prefetch=0,
            grid=(P, N, T),
            in_specs=[
                pl.BlockSpec((1, S, thw), in_idx),
                pl.BlockSpec((1, S, thw), in_idx),
                pl.BlockSpec((1, S, 1), lambda part, b, t: (b, 0, 0)),
            ],
            out_specs=pl.BlockSpec((1, S + 2, 1),
                                   lambda part, b, t: (part * N + b, 0, 0)),
        ),
        compiler_params=pltpu.CompilerParams(
            dimension_semantics=("parallel", "parallel", "arbitrary"),
            vmem_limit_bytes=48 * 1024 * 1024),
    )(pred3, gt3, dice_mask)

    # ---- combine partial accumulations (over the P split) ----
    stats = jnp.sum(acc.reshape(P, N, S + 2), axis=0)     # (N, S+2)
    inter = jnp.sum(stats[:, 0])
    psum = jnp.sum(stats[:, 1])
    gsum = jnp.sum(stats[:, 2])
    pairs_sq = stats[:, 3:]                                # (N, S-1)

    # ---- dice term ----
    dice = (2.0 * inter + smooth) / (psum + gsum + smooth)
    loss = 1.0 - dice

    # ---- slice-consistency term (tiny O(N*S) scalar logic in plain JAX) ----
    fs = 1.0 if force_strong is None else force_strong
    fw = 0.0 if force_weak is None else force_weak

    pair_norm = jnp.sqrt(pairs_sq)                         # (N, S-1)
    on = (mask_slices * float(HW)) > 1.0                   # "slice mask sum > 1"
    a, b = on[:, :-1], on[:, 1:]
    eligible = jnp.logical_not(jnp.logical_and(a, b))
    strong = jnp.logical_xor(a, b)
    w = jnp.where(strong, fs, fw)
    contrib = jnp.where(eligible, w * pair_norm, 0.0)
    n_elig = jnp.sum(eligible.astype(jnp.float32))
    # the PyTorch running update is exactly the mean of w*norm over eligible pairs
    loss_consist = jnp.sum(contrib) / jnp.maximum(n_elig, 1.0)

    return loss + 0.001 * loss_consist


def _reference(pred, gt, mask=None, force_strong=None, force_weak=None,
               logit=True, smooth=0.1):
    """NumPy reference matching the PyTorch module line by line."""
    pred = np.asarray(pred, np.float32)
    gt = np.asarray(gt, np.float32)
    N, S, H, W = pred.shape
    if mask is None:
        mask_full = np.ones_like(pred)
    else:
        m = np.asarray(mask, np.float32)[:, :, None, None]
        mask_full = np.tile(m, (1, 1, H, W))
    p = 1.0 / (1.0 + np.exp(-pred)) if logit else pred
    sel = mask_full.reshape(-1) == 1.0
    pv = p.reshape(-1)[sel]
    gv = gt.reshape(-1)[sel]
    dice = (2.0 * (pv * gv).sum() + smooth) / (pv.sum() + gv.sum() + smooth)
    loss = 1.0 - dice
    fs = 1.0 if force_strong is None else force_strong
    fw = 0.0 if force_weak is None else force_weak
    loss_consist = 0.0
    n = 1
    for bb in range(N):
        for j in range(S - 1):
            s0 = mask_full[bb, j].sum() > 1.0
            s1 = mask_full[bb, j + 1].sum() > 1.0
            if not (s0 and s1):
                wgt = fs if (s0 != s1) else fw
                nrm = np.linalg.norm(p[bb, j] - p[bb, j + 1])
                loss_consist = wgt * nrm / n + (n - 1) / n * loss_consist
                n += 1
    return float(loss) + 0.001 * float(loss_consist)


def _check(loss, ref):
    assert np.isclose(float(loss), ref, rtol=1e-4, atol=1e-5), (float(loss), ref)


if __name__ == "__main__":
    key = jax.random.PRNGKey(0)
    k1, k2, k3, k4, k5, k6 = jax.random.split(key, 6)

    # --- base case: N=2, S=8, 16x16 ---
    N, S, H, W = 2, 8, 16, 16
    pred = jax.random.normal(k1, (N, S, H, W), dtype=jnp.float32)
    gt = jax.random.bernoulli(k2, 0.3, (N, S, H, W)).astype(jnp.float32)
    mask = jnp.array([[1, 1, 0, 1, 0, 0, 1, 1],
                      [0, 1, 1, 1, 0, 0, 0, 1]], dtype=jnp.float32)

    loss = jax.block_until_ready(masked_dice_loss_slice_consist(pred, gt, mask))
    _check(loss, _reference(pred, gt, mask))

    loss2 = jax.block_until_ready(masked_dice_loss_slice_consist(pred, gt))
    _check(loss2, _reference(pred, gt))

    loss3 = jax.block_until_ready(
        masked_dice_loss_slice_consist(pred, gt, mask,
                                       force_strong=0.7, force_weak=0.3))
    _check(loss3, _reference(pred, gt, mask, force_strong=0.7, force_weak=0.3))

    # --- multi-chunk path: 64x64 -> 4096 lanes, two 2048-lane compute chunks ---
    pred_b = jax.random.normal(k3, (2, 8, 64, 64), dtype=jnp.float32)
    gt_b = jax.random.bernoulli(k4, 0.3, (2, 8, 64, 64)).astype(jnp.float32)
    loss4 = jax.block_until_ready(
        masked_dice_loss_slice_consist(pred_b, gt_b, mask))
    _check(loss4, _reference(pred_b, gt_b, mask))

    # --- N=1 (2-way parallel split) + non-multiple-of-tile HW (lane-masked tail) ---
    pred_c = jax.random.normal(k5, (1, 4, 48, 48), dtype=jnp.float32)
    gt_c = jax.random.bernoulli(k6, 0.3, (1, 4, 48, 48)).astype(jnp.float32)
    mask_c = jnp.array([[1, 0, 1, 1]], dtype=jnp.float32)
    loss5 = jax.block_until_ready(
        masked_dice_loss_slice_consist(pred_c, gt_c, mask_c))
    _check(loss5, _reference(pred_c, gt_c, mask_c))

    # TODO(synk): all reductions accumulate in plain f32; for very large volumes
    # consider per-slice partials reduced in the wrapper if tolerance tightens.
    print("KERNEL_OK")
</pallas_src>

<mosaic_0001>
module attributes {stable_mosaic.version = 11 : i64} {
  func.func @_dice_consist_kernel(%arg0: i32, %arg1: i32, %arg2: i32, %arg3: memref<1x8x256xf32, #tpu.memory_space<vmem>>, %arg4: memref<1x8x256xf32, #tpu.memory_space<vmem>>, %arg5: memref<1x8x1xf32, #tpu.memory_space<vmem>>, %arg6: memref<1x10x1xf32, #tpu.memory_space<vmem>>) attributes {dimension_semantics = [#tpu.dimension_semantics<parallel>, #tpu.dimension_semantics<parallel>, #tpu.dimension_semantics<arbitrary>], iteration_bounds = array<i64: 1, 2, 1>, scalar_prefetch = 0 : i64, scratch_operands = 0 : i64, tpu.core_type = #tpu.core_type<tc>, window_params = [{transform_indices = @transform_0, window_bounds = array<i64: 1, 8, 256>}, {transform_indices = @transform_1, window_bounds = array<i64: 1, 8, 256>}, {transform_indices = @transform_2, window_bounds = array<i64: 1, 8, 1>}, {transform_indices = @transform_3, window_bounds = array<i64: 1, 10, 1>}]} {
    %c0_i32 = arith.constant 0 : i32
    %0 = arith.cmpi eq, %arg2, %c0_i32 : i32
    %1 = arith.extui %0 : i1 to i32
    %c0_i32_0 = arith.constant 0 : i32
    %2 = arith.cmpi ne, %1, %c0_i32_0 : i32
    scf.if %2 {
      %cst_43 = arith.constant 0.000000e+00 : f32
      %70 = vector.broadcast %cst_43 : f32 to vector<1x10x1xf32>
      %c0_44 = arith.constant 0 : index
      %c0_45 = arith.constant 0 : index
      %c0_46 = arith.constant 0 : index
      %71 = vector.load %arg6[%c0_44, %c0_45, %c0_46] : memref<1x10x1xf32, #tpu.memory_space<vmem>>, vector<1x10x1xf32>
      tpu.vector_store %arg6[%c0_44, %c0_45, %c0_46], %70 {strides = array<i32>} : memref<1x10x1xf32, #tpu.memory_space<vmem>>, vector<1x10x1xf32>,
    } else {
    }
    %c0 = arith.constant 0 : index
    %c0_1 = arith.constant 0 : index
    %c0_2 = arith.constant 0 : index
    %3 = vector.load %arg5[%c0, %c0_1, %c0_2] : memref<1x8x1xf32, #tpu.memory_space<vmem>>, vector<1x8x1xf32>
    %4 = vector.shape_cast %3 : vector<1x8x1xf32> to vector<8x1xf32>
    %cst = arith.constant 0.000000e+00 : f32
    %5 = vector.broadcast %cst : f32 to vector<8x1xf32>
    %cst_3 = arith.constant 0.000000e+00 : f32
    %6 = vector.broadcast %cst_3 : f32 to vector<8x1xf32>
    %cst_4 = arith.constant 0.000000e+00 : f32
    %7 = vector.broadcast %cst_4 : f32 to vector<8x1xf32>
    %cst_5 = arith.constant 0.000000e+00 : f32
    %8 = vector.broadcast %cst_5 : f32 to vector<7x1xf32>
    %c0_6 = arith.constant 0 : index
    %c0_7 = arith.constant 0 : index
    %c0_8 = arith.constant 0 : index
    %9 = vector.load %arg3[%c0_6, %c0_7, %c0_8] : memref<1x8x256xf32, #tpu.memory_space<vmem>>, vector<1x8x256xf32>
    %10 = vector.shape_cast %9 : vector<1x8x256xf32> to vector<8x256xf32>
    %c0_9 = arith.constant 0 : index
    %c0_10 = arith.constant 0 : index
    %c0_11 = arith.constant 0 : index
    %11 = vector.load %arg4[%c0_9, %c0_10, %c0_11] : memref<1x8x256xf32, #tpu.memory_space<vmem>>, vector<1x8x256xf32>
    %12 = vector.shape_cast %11 : vector<1x8x256xf32> to vector<8x256xf32>
    %cst_12 = arith.constant 5.000000e-01 : f32
    %13 = vector.broadcast %cst_12 : f32 to vector<8x256xf32>
    %14 = arith.mulf %10, %13 : vector<8x256xf32>
    %15 = math.tanh %14 : vector<8x256xf32>
    %cst_13 = arith.constant 5.000000e-01 : f32
    %16 = vector.broadcast %cst_13 : f32 to vector<8x256xf32>
    %17 = arith.mulf %15, %16 : vector<8x256xf32>
    %cst_14 = arith.constant 5.000000e-01 : f32
    %18 = vector.broadcast %cst_14 : f32 to vector<8x256xf32>
    %19 = arith.addf %17, %18 : vector<8x256xf32>
    %20 = arith.mulf %19, %12 : vector<8x256xf32>
    %cst_15 = arith.constant dense<0.000000e+00> : vector<8xf32>
    %21 = vector.multi_reduction <add>, %20, %cst_15 [1] : vector<8x256xf32> to vector<8xf32>
    %22 = vector.shape_cast %21 : vector<8xf32> to vector<8x1xf32>
    %23 = arith.addf %5, %22 : vector<8x1xf32>
    %cst_16 = arith.constant dense<0.000000e+00> : vector<8xf32>
    %24 = vector.multi_reduction <add>, %19, %cst_16 [1] : vector<8x256xf32> to vector<8xf32>
    %25 = vector.shape_cast %24 : vector<8xf32> to vector<8x1xf32>
    %26 = arith.addf %6, %25 : vector<8x1xf32>
    %cst_17 = arith.constant dense<0.000000e+00> : vector<8xf32>
    %27 = vector.multi_reduction <add>, %12, %cst_17 [1] : vector<8x256xf32> to vector<8xf32>
    %28 = vector.shape_cast %27 : vector<8xf32> to vector<8x1xf32>
    %29 = arith.addf %7, %28 : vector<8x1xf32>
    %30 = vector.extract_strided_slice %19 {offsets = [1, 0], sizes = [7, 256], strides = [1, 1]} : vector<8x256xf32> to vector<7x256xf32>
    %31 = vector.extract_strided_slice %19 {offsets = [0, 0], sizes = [7, 256], strides = [1, 1]} : vector<8x256xf32> to vector<7x256xf32>
    %32 = arith.subf %30, %31 : vector<7x256xf32>
    %33 = arith.mulf %32, %32 : vector<7x256xf32>
    %cst_18 = arith.constant dense<0.000000e+00> : vector<7xf32>
    %34 = vector.multi_reduction <add>, %33, %cst_18 [1] : vector<7x256xf32> to vector<7xf32>
    %35 = vector.shape_cast %34 : vector<7xf32> to vector<7x1xf32>
    %36 = arith.addf %8, %35 : vector<7x1xf32>
    %c0_19 = arith.constant 0 : index
    %c0_20 = arith.constant 0 : index
    %c0_21 = arith.constant 0 : index
    %37 = vector.load %arg6[%c0_19, %c0_20, %c0_21] : memref<1x10x1xf32, #tpu.memory_space<vmem>>, vector<1x1x1xf32>
    %38 = vector.shape_cast %37 : vector<1x1x1xf32> to vector<1x1xf32>
    %39 = arith.mulf %23, %4 : vector<8x1xf32>
    %cst_22 = arith.constant dense<0.000000e+00> : vector<1xf32>
    %40 = vector.multi_reduction <add>, %39, %cst_22 [0] : vector<8x1xf32> to vector<1xf32>
    %41 = vector.shape_cast %40 : vector<1xf32> to vector<1x1xf32>
    %42 = arith.addf %38, %41 : vector<1x1xf32>
    %c0_23 = arith.constant 0 : index
    %c0_24 = arith.constant 0 : index
    %c0_25 = arith.constant 0 : index
    %43 = vector.load %arg6[%c0_23, %c0_24, %c0_25] : memref<1x10x1xf32, #tpu.memory_space<vmem>>, vector<1x1x1xf32>
    %44 = vector.shape_cast %43 : vector<1x1x1xf32> to vector<1x1xf32>
    %45 = vector.shape_cast %42 : vector<1x1xf32> to vector<1x1x1xf32>
    tpu.vector_store %arg6[%c0_23, %c0_24, %c0_25], %45 {strides = array<i32>} : memref<1x10x1xf32, #tpu.memory_space<vmem>>, vector<1x1x1xf32>,
    %c0_26 = arith.constant 0 : index
    %c1 = arith.constant 1 : index
    %c0_27 = arith.constant 0 : index
    %46 = vector.load %arg6[%c0_26, %c1, %c0_27] : memref<1x10x1xf32, #tpu.memory_space<vmem>>, vector<1x1x1xf32>
    %47 = vector.shape_cast %46 : vector<1x1x1xf32> to vector<1x1xf32>
    %48 = arith.mulf %26, %4 : vector<8x1xf32>
    %cst_28 = arith.constant dense<0.000000e+00> : vector<1xf32>
    %49 = vector.multi_reduction <add>, %48, %cst_28 [0] : vector<8x1xf32> to vector<1xf32>
    %50 = vector.shape_cast %49 : vector<1xf32> to vector<1x1xf32>
    %51 = arith.addf %47, %50 : vector<1x1xf32>
    %c0_29 = arith.constant 0 : index
    %c1_30 = arith.constant 1 : index
    %c0_31 = arith.constant 0 : index
    %52 = vector.load %arg6[%c0_29, %c1_30, %c0_31] : memref<1x10x1xf32, #tpu.memory_space<vmem>>, vector<1x1x1xf32>
    %53 = vector.shape_cast %52 : vector<1x1x1xf32> to vector<1x1xf32>
    %54 = vector.shape_cast %51 : vector<1x1xf32> to vector<1x1x1xf32>
    tpu.vector_store %arg6[%c0_29, %c1_30, %c0_31], %54 {strides = array<i32>} : memref<1x10x1xf32, #tpu.memory_space<vmem>>, vector<1x1x1xf32>,
    %c0_32 = arith.constant 0 : index
    %c2 = arith.constant 2 : index
    %c0_33 = arith.constant 0 : index
    %55 = vector.load %arg6[%c0_32, %c2, %c0_33] : memref<1x10x1xf32, #tpu.memory_space<vmem>>, vector<1x1x1xf32>
    %56 = vector.shape_cast %55 : vector<1x1x1xf32> to vector<1x1xf32>
    %57 = arith.mulf %29, %4 : vector<8x1xf32>
    %cst_34 = arith.constant dense<0.000000e+00> : vector<1xf32>
    %58 = vector.multi_reduction <add>, %57, %cst_34 [0] : vector<8x1xf32> to vector<1xf32>
    %59 = vector.shape_cast %58 : vector<1xf32> to vector<1x1xf32>
    %60 = arith.addf %56, %59 : vector<1x1xf32>
    %c0_35 = arith.constant 0 : index
    %c2_36 = arith.constant 2 : index
    %c0_37 = arith.constant 0 : index
    %61 = vector.load %arg6[%c0_35, %c2_36, %c0_37] : memref<1x10x1xf32, #tpu.memory_space<vmem>>, vector<1x1x1xf32>
    %62 = vector.shape_cast %61 : vector<1x1x1xf32> to vector<1x1xf32>
    %63 = vector.shape_cast %60 : vector<1x1xf32> to vector<1x1x1xf32>
    tpu.vector_store %arg6[%c0_35, %c2_36, %c0_37], %63 {strides = array<i32>} : memref<1x10x1xf32, #tpu.memory_space<vmem>>, vector<1x1x1xf32>,
    %c0_38 = arith.constant 0 : index
    %c3 = arith.constant 3 : index
    %c0_39 = arith.constant 0 : index
    %64 = vector.load %arg6[%c0_38, %c3, %c0_39] : memref<1x10x1xf32, #tpu.memory_space<vmem>>, vector<1x7x1xf32>
    %65 = vector.shape_cast %64 : vector<1x7x1xf32> to vector<7x1xf32>
    %66 = arith.addf %65, %36 : vector<7x1xf32>
    %c0_40 = arith.constant 0 : index
    %c3_41 = arith.constant 3 : index
    %c0_42 = arith.constant 0 : index
    %67 = vector.load %arg6[%c0_40, %c3_41, %c0_42] : memref<1x10x1xf32, #tpu.memory_space<vmem>>, vector<1x7x1xf32>
    %68 = vector.shape_cast %67 : vector<1x7x1xf32> to vector<7x1xf32>
    %69 = vector.shape_cast %66 : vector<7x1xf32> to vector<1x7x1xf32>
    tpu.vector_store %arg6[%c0_40, %c3_41, %c0_42], %69 {strides = array<i32>} : memref<1x10x1xf32, #tpu.memory_space<vmem>>, vector<1x7x1xf32>,
    return
  }
  func.func @transform_0(%arg0: i32, %arg1: i32, %arg2: i32) -> (i32, i32, i32) {
    %c1_i32 = arith.constant 1 : i32
    %0 = arith.muli %arg0, %c1_i32 : i32
    %1 = arith.addi %0, %arg2 : i32
    %c0_i32 = arith.constant 0 : i32
    %c0_i32_0 = arith.constant 0 : i32
    return %arg1, %c0_i32, %1 : i32, i32, i32
  }
  func.func @transform_1(%arg0: i32, %arg1: i32, %arg2: i32) -> (i32, i32, i32) {
    %c1_i32 = arith.constant 1 : i32
    %0 = arith.muli %arg0, %c1_i32 : i32
    %1 = arith.addi %0, %arg2 : i32
    %c0_i32 = arith.constant 0 : i32
    %c0_i32_0 = arith.constant 0 : i32
    return %arg1, %c0_i32, %1 : i32, i32, i32
  }
  func.func @transform_2(%arg0: i32, %arg1: i32, %arg2: i32) -> (i32, i32, i32) {
    %c0_i32 = arith.constant 0 : i32
    %c0_i32_0 = arith.constant 0 : i32
    %c0_i32_1 = arith.constant 0 : i32
    return %arg1, %c0_i32, %c0_i32_0 : i32, i32, i32
  }
  func.func @transform_3(%arg0: i32, %arg1: i32, %arg2: i32) -> (i32, i32, i32) {
    %c2_i32 = arith.constant 2 : i32
    %0 = arith.muli %arg0, %c2_i32 : i32
    %1 = arith.addi %0, %arg1 : i32
    %c0_i32 = arith.constant 0 : i32
    %c0_i32_0 = arith.constant 0 : i32
    %c0_i32_1 = arith.constant 0 : i32
    return %1, %c0_i32, %c0_i32_0 : i32, i32, i32
  }
}

</mosaic_0001>

<bundles_post_ra>
// kernel: tpu_custom_call.1
= control target key start
LH: loop header
LB: loop body
LE: loop exit
PB: predicated region body
PF: predicated region fallthrough
CT: control target
= control target key end

     0   :  { %8 = vsyncpa [#allocation3], 0  ;;  %s935_s0 = inlined_call_operand.hbm [shape: f32[2,8,256], index: 0, kind: input, shape index: {}]   ;;  %s936_s1 = inlined_call_operand.hbm [shape: f32[2,8,256], index: 1, kind: input, shape index: {}]   ;;  %s937_s2 = inlined_call_operand.vmem [shape: f32[2,8,1], index: 2, kind: input, shape index: {}]   ;;  %s938_s3 = inlined_call_operand.vmem [shape: f32[2,10,1], index: 3, kind: output, shape index: {}]  }
   0x1   :  { %10 = vsyncpa [#allocation3 + $0x1], 0 }
   0x2   :  { %11 = vsyncpa [#allocation5], 0 }
   0x3   :  { %13 = vsyncpa [#allocation5 + $0x1], 0  ;;  %s737_s12 = smov 0   ;;  %s739_s13 = smov 0  }
   0x4   :  { %s741_s14 = smov 0   ;;  %s743_s15 = smov 0  }
   0x5   :  { %s745_s16 = smov 0   ;;  %s747_s17 = smov 0  }
   0x6 LB: > { %s512_s18 = sadd.s32 4294967295, %s712_s17   ;;  %s34_s19 = sadd.s32 1, %s708_s16  ;;  %s712_s17 = sphi %s747_s17, %s19_s17   ;;  %s708_s16 = sphi %s745_s16, %s952_s16   ;;  %s704_s15 = sphi %s743_s15, %s951_s15   ;;  %s700_s14 = sphi %s741_s14, %s950_s14   ;;  %s696_s13 = sphi %s739_s13, %s949_s13   ;;  %s692_s12 = sphi %s737_s12, %s948_s12  }
   0x7   : > { %p36_p0 = scmp.ge.s32.totalorder %s34_s19, 2  ;;  %s49_s20 = sadd.s32 1, %s700_s14 }
   0x8   : > { %p56_p1 = scmp.ne.s32.totalorder %s700_s14, %s696_s13  ;;  %p57_p2 = scmp.eq.s32.totalorder %s712_s17, 0 }
   0x9   : > { %s954_s19 = smov (%p36_p0, %s34_s19), 0  ;;  %p62_p4 = scmp.ne.s32.totalorder %s696_s13, %s692_s12 }
   0xa   : > { %p773_p3 = por %p57_p2, %p56_p1  ;;  %s44_s22 = ssub.s32 %s708_s16, %s954_s19 }
   0xb   : > { %p63_p5 = scmp.eq.s32.totalorder %s512_s18, 0  ;;  %p47_p6 = scmp.eq.s32.totalorder %s44_s22, 0 }
   0xc   : > { %p544_p8 = scmp.lt.s32.totalorder %s712_s17, 2  ;;  %s789_s25 = sand.u32 1, %s700_s14  }
   0xd   : > { %p780_p7 = por %p63_p5, %p62_p4  ;;  %s530_s26 = sshll.u32 %s708_s16, 8 }
   0xe   : > { %s786_s24 = scalar_select %p47_p6, %s700_s14, %s49_s20  }
   0xf   : > { %s941_s23 = scalar_select %p780_p7, 1, 0 }
  0x10   : > { %s516_s27 = sshll.u32 %s789_s25, 4  ;;  %s798_s30 = scalar_lea.hbm %s935_s0, %s530_s26 }
  0x11   : > { %s176_s4 = scalar_lea.vmem [#allocation2], %s516_s27  ;;  %p804_p9 = pnand %p544_p8, %p773_p3 }
  0x12   : > { %s187_s5 = sshll.u32 %s176_s4, 4  ;;  %s173_s7 = scalar_lea.sflag [#allocation3], %s789_s25  ;;  %s808_s5 = int_to_ptr.vmem [resolvable:$true] %s187_s5 }
  0x13   : > { %s598_s8 = scalar_lea.hbm %s798_s30, 256  ;;  %p600_p13 = pneg %p804_p9 }
  0x14   : > { %p599_p12 = scmp.ne.s32.totalorder %s798_s30, %s598_s8  ;;  %s603_s11 = scalar_lea.hbm %s935_s0, 512 }
  0x15   : > { %p604_p2 = scmp.lt.u32.totalorder %s798_s30, %s935_s0  ;;  %p605_p3 = scmp.lt.u32.totalorder %s603_s11, %s598_s8 }
  0x16   : > { %p601_p0 = pnand %p600_p13, %p599_p12  ;;  %p607_p5 = scmp.lt.u32.totalorder %s598_s8, %s798_s30 }
  0x17   : > { %p606_p4 = por %p605_p3, %p604_p2 }
  0x18   : > { %p602_p1 = pneg %p601_p0 }
  0x19   : > { %p608_p6 = por %p607_p5, %p606_p4 }
  0x1b   : > { %p609_p8 = pnand %p608_p6, %p602_p1 }
  0x1d   : > { %612 = shalt.err (!%p609_p8)
}
  0x1e   : > { %s613_s20 = scalar_lea.vmem %s808_s5, 256  ;;  %s714_s21 = smov [#allocation2]  }
  0x1f   : > { %p614_p12 = scmp.ne.s32.totalorder %s808_s5, %s613_s20  ;;  %s618_s22 = sshll.u32 %s714_s21, 4  ;;  %s619_s22 = int_to_ptr.vmem [resolvable:$false] %s618_s22 }
  0x20   : > { %s620_s28 = scalar_lea.vmem %s619_s22, 512  ;;  %p621_p11 = scmp.lt.s32.totalorder %s808_s5, %s619_s22 }
  0x21   : > { %p616_p0 = pnand %p614_p12, %p600_p13  ;;  %p622_p2 = scmp.lt.s32.totalorder %s620_s28, %s613_s20 }
  0x23   : > { %p617_p10 = pneg %p616_p0  ;;  %p623_p3 = por %p622_p2, %p621_p11 }
  0x25   : > { %p624_p4 = pnand %p623_p3, %p617_p10 }
  0x27   : > { %627 = shalt.err (!%p624_p4)
}
  0x28   : > { %540 = dma.hbm_to_vmem [thread:$0]  (!%p804_p9), %s798_s30, 256, %s808_s5, %s173_s7  }
  0x29   : > { %p943_p1 = scmp.lt.s32.totalorder %s712_s17, 3  ;;  %p944_p5 = scmp.ge.s32.totalorder %s712_s17, 1 }
  0x2a   : > { %s851_s9 = scalar_lea.hbm %s936_s1, %s530_s26  ;;  %s198_s10 = scalar_lea.vmem [#allocation4], %s516_s27 }
  0x2b   : > { %p842_p6 = pnand %p944_p5, %p943_p1  ;;  %s209_s11 = sshll.u32 %s198_s10, 4  ;;  %s210_s11 = int_to_ptr.vmem [resolvable:$true] %s209_s11 }
  0x2c   : > { %s195_s30 = scalar_lea.sflag [#allocation5], %s789_s25  ;;  %s628_s5 = scalar_lea.hbm %s851_s9, 256 }
  0x2d   : > { %s945_s29 = scalar_select %p842_p6, 1, 0 }
  0x2e   : > { %p629_p10 = scmp.ne.s32.totalorder %s851_s9, %s628_s5  ;;  %s633_s26 = scalar_lea.hbm %s936_s1, 512 }
  0x2f   : > { %p634_p12 = scmp.lt.u32.totalorder %s851_s9, %s936_s1  ;;  %p635_p0 = scmp.lt.u32.totalorder %s633_s26, %s628_s5 }
  0x30   : > { %p631_p11 = pnand %p629_p10, %p600_p13  ;;  %p637_p3 = scmp.lt.u32.totalorder %s628_s5, %s851_s9 }
  0x31   : > { %p636_p2 = por %p635_p0, %p634_p12 }
  0x32   : > { %p632_p8 = pneg %p631_p11 }
  0x33   : > { %p638_p4 = por %p637_p3, %p636_p2 }
  0x35   : > { %p639_p1 = pnand %p638_p4, %p632_p8 }
  0x37   : > { %642 = shalt.err (!%p639_p1)
}
  0x38   : > { %s643_s25 = scalar_lea.vmem %s210_s11, 256  ;;  %s715_s27 = smov [#allocation4]  }
  0x39   : > { %p644_p5 = scmp.ne.s32.totalorder %s210_s11, %s643_s25  ;;  %s648_s21 = sshll.u32 %s715_s27, 4  ;;  %s649_s21 = int_to_ptr.vmem [resolvable:$false] %s648_s21 }
  0x3a   : > { %s650_s22 = scalar_lea.vmem %s649_s21, 512  ;;  %p651_p7 = scmp.lt.s32.totalorder %s210_s11, %s649_s21 }
  0x3b   : > { %p646_p10 = pnand %p644_p5, %p600_p13  ;;  %p652_p6 = scmp.lt.s32.totalorder %s650_s22, %s643_s25 }
  0x3d   : > { %p647_p11 = pneg %p646_p10  ;;  %p653_p0 = por %p652_p6, %p651_p7 }
  0x3f   : > { %p654_p12 = pnand %p653_p0, %p647_p11 }
  0x41   : > { %657 = shalt.err (!%p654_p12)
}
  0x42   : > { %543 = dma.hbm_to_vmem [thread:$0]  (!%p804_p9), %s851_s9, 256, %s210_s11, %s195_s30  }
  0x43   : > { %p946_p8 = scmp.ne.s32.totalorder %s945_s29, 0 }
  0x44   : > { %s227_s28 = sand.u32 (!%p946_p8), 1, %s696_s13   ;;  %p947_p13 = scmp.ne.s32.totalorder (!%p946_p8), %s941_s23, 0 }
  0x45   : > { %225 = sbr.rel (%p946_p8) target bundleno = 267 (0x10b), region = 32  ;;  %s523_s4 = sshll.u32 (!%p946_p8), %s227_s28, 4 }
  0x46   : > { %s228_s8 = scalar_lea.sflag (!%p946_p8), [#allocation3], %s227_s28  ;;  %s231_s10 = scalar_lea.vmem (!%p946_p8), [#allocation2], %s523_s4 }
  0x4c   : > { %683 = dma.done.wait (%p947_p13), %s228_s8, 256  }
  0x4d   : > { %685 = vsyncadd (%p947_p13), %s228_s8, 4294967040  ;;  %s237_s5 = scalar_lea.sflag [#allocation5], %s227_s28  ;;  %s240_s7 = scalar_lea.vmem [#allocation4], %s523_s4 }
  0x4e   : > { %687 = dma.done.wait (%p947_p13), %s237_s5, 256  }
  0x4f   : > { %689 = vsyncadd (%p947_p13), %s237_s5, 4294967040  ;;  %p278_p7 = scmp.lt.s32.totalorder %s704_s15, 1  ;;  %vm297_vm0 = vcmask 1024   ;;  %vm295_vm1 = vcmask 7168   ;;  %v716_v0 = vmov 0.0   ;;  %v302_v1 = vld [vmem:[%s240_s7] sm:$0xff] }
  0x50   : > { %v303_v2 = vld [vmem:[%s240_s7 + $0x8] sm:$0xff]  ;;  %v300_v3 = vld [vmem:[%s231_s10] sm:$0xff]  ;;  %vm336_vm2 = vcmask 1047553   ;;  %vm354_vm3 = vcmask 0   ;;  %vm383_vm4 = vcmask 6144  }
  0x51   : > { %s956_s15 = smov (!%p278_p7, %s704_s15), 1  ;;  %v322_v4 = vadd.f32 %v303_v2, %v302_v1  ;;  %v301_v5 = vld [vmem:[%s231_s10 + $0x8] sm:$0xff]  ;;  %v304_v6 = vmul.f32 0.5, %v300_v3 }
  0x52   : > { %s532_s6 = sshll.u32 %s956_s15, 4  ;;  %v305_v7 = vmul.f32 0.5, %v301_v5  ;;  %s525_s23 = sshll.u32 %s956_s15, 3 }
  0x53   : > { %s894_s11 = scalar_lea.vmem %s938_s3, %s532_s6  ;;  %323 = vadd.xlane.f32.xlu1 %v322_v4  ;;  %594 = vtanh.f32 %v304_v6  ;;  %s281_s26 = scalar_lea.vmem %s937_s2, %s525_s23 }
  0x54   : > { %296 = vst.msk [vmem:[%s894_s11] sm:$0xff] %vm295_vm1, %v716_v0  ;;  %596 = vtanh.f32 %v305_v7  ;;  %v299_v27 = vld [vmem:[%s281_s26] sm:$0xff] }
  0x55   : > { %298 = vst.msk [vmem:[%s894_s11 + $0x8] sm:$0x3] %vm297_vm0, %v716_v0 }
  0x5b   : > { %v367_v36 = vld [vmem:[%s894_s11 + $0x2] sm:$0x1]  ;;  %v343_v57 = vld [vmem:[%s894_s11] sm:$0x1]  ;;  %v356_v62 = vld [vmem:[%s894_s11 + $0x1] sm:$0x1] }
  0x5c   : > { %v378_v46 = vld [vmem:[%s894_s11 + $0x3] sm:$0x7f] }
  0x5d   : > { %v595_v8 = vpop.eup %594 }
  0x5e   : > { %v597_v9 = vpop.eup %596  ;;  %v308_v10 = vmul.f32 0.5, %v595_v8 }
  0x5f   : > { %v309_v11 = vmul.f32 0.5, %v597_v9 }
  0x60   : > { %v310_v12 = vadd.f32 0.5, %v308_v10 }
  0x61   : > { %v311_v13 = vadd.f32 0.5, %v309_v11 }
  0x62   : > { %v312_v14 = vmul.f32 %v310_v12, %v302_v1  ;;  %v328_v15 = vrot.slane %v310_v12, 7 }
  0x63   : > { %v313_v16 = vmul.f32 %v311_v13, %v303_v2  ;;  %v329_v17 = vrot.slane %v311_v13, 7  ;;  %v318_v22 = vadd.f32 %v311_v13, %v310_v12 }
  0x64   : > { %v332_v18 = vsub.f32 %v310_v12, %v328_v15 }
  0x65   : > { %v314_v19 = vadd.f32 %v313_v16, %v312_v14  ;;  %v333_v20 = vsub.f32 %v311_v13, %v329_v17 }
  0x66   : > { %v334_v21 = vmul.f32 %v332_v18, %v332_v18 }
  0x67   : > { %315 = vadd.xlane.f32.xlu0 %v314_v19  ;;  %v335_v23 = vmul.f32 %v333_v20, %v333_v20 }
  0x68   : > { %v337_v24 = vsel %vm336_vm2, %v334_v21, 0.0 }
  0x69   : > { %v338_v25 = vsel %vm336_vm2, %v335_v23, 0.0 }
  0x6a   : > { %v339_v26 = vadd.f32 %v338_v25, %v337_v24 }
  0x6b   : > { %319 = vadd.xlane.f32.xlu0 %v318_v22 }
  0x6c   : > { %340 = vadd.xlane.f32.xlu1 %v339_v26 }
  0xe0   : > { %v324_v28 = vpop.xlane.xlu1 %323 }
  0xe1   : > { %v368_v29 = vmul.f32 %v324_v28, %v299_v27 }
  0xe3   : > { %v369_v30 = vsel %vm295_vm1, %v368_v29, 0.0 }
  0xe4   : > { %v370_v31 = vrot.slane %v369_v30, 4 }
  0xe6   : > { %v371_v32 = vadd.f32 %v370_v31, %v369_v30 }
  0xe8   : > { %v372_v33 = vrot.slane %v371_v32, 2 }
  0xea   : > { %v373_v34 = vadd.f32 %v372_v33, %v371_v32 }
  0xec   : > { %v374_v35 = vrot.slane %v373_v34, 1 }
  0xee   : > { %v375_v37 = vadd.f32 %v374_v35, %v373_v34 }
  0xf0   : > { %v376_v38 = vadd.f32 %v375_v37, %v367_v36 }
  0xf2   : > { %377 = vst.msk [vmem:[%s894_s11 + $0x2] sm:$0x1] %vm354_vm3, %v376_v38 }
  0xf4   : > { %v316_v39 = vpop.xlane.xlu0 %315 }
  0xf5   : > { %v344_v40 = vmul.f32 %v316_v39, %v299_v27 }
  0xf7   : > { %v346_v41 = vsel %vm295_vm1, %v344_v40, 0.0 }
  0xf8   : > { %v347_v42 = vrot.slane %v346_v41, 4  ;;  %v320_v43 = vpop.xlane.xlu0 %319 }
  0xf9   : > { %v357_v44 = vmul.f32 %v320_v43, %v299_v27  ;;  %v341_v45 = vpop.xlane.xlu1 %340 }
  0xfa   : > { %v348_v47 = vadd.f32 %v347_v42, %v346_v41  ;;  %v380_v48 = vrot.slane %v341_v45, 1 }
  0xfb   : > { %v358_v49 = vsel %vm295_vm1, %v357_v44, 0.0 }
  0xfc   : > { %v349_v50 = vrot.slane %v348_v47, 2  ;;  %v359_v51 = vrot.slane %v358_v49, 4  ;;  %v382_v52 = vadd.f32 %v380_v48, %v378_v46 }
  0xfe   : > { %v350_v53 = vadd.f32 %v349_v50, %v348_v47  ;;  %v360_v54 = vadd.f32 %v359_v51, %v358_v49  ;;  %384 = vst.msk [vmem:[%s894_s11 + $0x3] sm:$0x7f] %vm383_vm4, %v382_v52 }
 0x100   : > { %v351_v55 = vrot.slane %v350_v53, 1  ;;  %v361_v56 = vrot.slane %v360_v54, 2 }
 0x102   : > { %v352_v58 = vadd.f32 %v351_v55, %v350_v53  ;;  %v362_v59 = vadd.f32 %v361_v56, %v360_v54 }
 0x104   : > { %v353_v60 = vadd.f32 %v352_v58, %v343_v57  ;;  %v363_v61 = vrot.slane %v362_v59, 1 }
 0x106   : > { %355 = vst.msk [vmem:[%s894_s11] sm:$0x1] %vm354_vm3, %v353_v60  ;;  %v364_v63 = vadd.f32 %v363_v61, %v362_v59 }
 0x108   : > { %v365_v0 = vadd.f32 %v364_v63, %v356_v62 }
 0x10a   : > { %366 = vst.msk [vmem:[%s894_s11 + $0x1] sm:$0x1] %vm354_vm3, %v365_v0 }
 0x10b PF: > { %s19_s17 = sadd.s32 1, %s712_s17   ;;  %s948_s12 = smov %s696_s13 }
 0x10c   : > { %p16_p9 = scmp.ge.s32.totalorder %s19_s17, 4   ;;  %s949_s13 = smov %s700_s14 }
 0x10d   : > { %s950_s14 = smov %s786_s24  ;;  %s951_s15 = smov %s708_s16 }
 0x10e   : > { %s952_s16 = smov %s954_s19  ;;  %18 = sbr.rel (!%p16_p9) target bundleno = 6 (0x6), region = 92 }
 0x115   :  { %412 = vsyncpa [#allocation3], 1 }
 0x116   :  { %414 = vsyncpa [#allocation3 + $0x1], 1 }
 0x117   :  { %415 = vsyncpa [#allocation5], 1 }
 0x118   :  { %417 = vsyncpa [#allocation5 + $0x1], 1 }

</bundles_post_ra>
